<compile_context>
chip_gen: v5e
topology: v5e:2x2
jax: 0.10.0
libtpu: 0.0.40
codegen_flags: <defaults>
</compile_context>

<pallas_src>
import jax
import jax.numpy as jnp
from jax.experimental import pallas as pl
from jax.experimental.pallas import tpu as pltpu

N_POP = 1.0        # the reference script does N = N / N  ->  1.0
HID = 32           # hidden width of every layer
HID_OUT = 8        # padded number of "real" output rows kept for layer 5
N_LAYERS = 5       # 1 -> 32 -> 32 -> 32 -> 32 -> 3
LANE_CHUNK = 128   # one full lane group per in-kernel batch chunk


def _net_sir_kernel(x_ref, w_ref, b_ref, out_ref):
    """x_ref: (1, Bp) times on lanes (Bp multiple of 128);
    w_ref: (5, 32, 32) zero-padded PyTorch-layout weights (out, in);
    b_ref: (5, 32, 1) zero-padded biases.

    out_ref: (8, Bp) rows = [I, R, Ic, S, Inew, <unwritten>, <unwritten>, <unwritten>].
    """
    Bp = x_ref.shape[1]
    n_chunks = Bp // LANE_CHUNK

    # ---- hoist all parameter loads out of the lane-chunk loop ---------------
    w1c = w_ref[0][:, 0:1]            # (32, 1)  real column of the 1->32 layer
    b1 = b_ref[0]                     # (32, 1)
    w2, b2 = w_ref[1], b_ref[1]       # (32, 32), (32, 1)
    w3, b3 = w_ref[2], b_ref[2]
    w4, b4 = w_ref[3], b_ref[3]
    w5 = w_ref[4][0:HID_OUT, :]       # (8, 32)  rows 3..7 are zero padding
    b5 = b_ref[4][0:HID_OUT, :]       # (8, 1)

    # ---- independent 128-lane chunks: gives the scheduler ILP ---------------
    for c in range(n_chunks):
        lo, hi = c * LANE_CHUNK, (c + 1) * LANE_CHUNK
        x = x_ref[:, lo:hi]                                   # (1, 128)

        # layer 1: in_features == 1 -> VPU broadcast multiply, not an MXU K=1 op
        h = jnp.tanh(w1c * x + b1)                            # (32, 128)

        # layers 2-4: (32,32) @ (32,128) on the MXU
        h = jnp.tanh(jnp.dot(w2, h, preferred_element_type=jnp.float32) + b2)
        h = jnp.tanh(jnp.dot(w3, h, preferred_element_type=jnp.float32) + b3)
        h = jnp.tanh(jnp.dot(w4, h, preferred_element_type=jnp.float32) + b4)

        # layer 5 (only 8 rows) + sigmoid on (8, 128)
        o = jax.nn.sigmoid(
            jnp.dot(w5, h, preferred_element_type=jnp.float32) + b5)  # (8, 128)

        # direct row stores; no sublane concat, no zero-row stores
        out_ref[0:3, lo:hi] = o[0:3, :]                       # I, R, Ic
        out_ref[3:4, lo:hi] = N_POP - o[0:1, :] - o[1:2, :]   # S
        # rows 5..7 intentionally left unwritten (wrapper never reads them)

    # ---- Inew over the FULL padded row via one XLU rotate -------------------
    # roll by Bp-1 (== shift of -1): ic_next[j] = Ic[j+1]; wrapped last lane is
    # meaningless and is sliced off by the wrapper.
    ic = out_ref[2:3, :]                                      # (1, Bp)
    ic_next = pltpu.roll(ic, shift=Bp - 1, axis=1)
    out_ref[4:5, :] = ic_next - ic                            # Inew


def init_params(key, dtype=jnp.float32):
    """PyTorch-style nn.Linear params: W (out, in), b (out,), U(-1/sqrt(in), +)."""
    sizes = [(1, 32), (32, 32), (32, 32), (32, 32), (32, 3)]
    params = []
    for (fan_in, fan_out) in sizes:
        key, kw, kb = jax.random.split(key, 3)
        bound = 1.0 / (fan_in ** 0.5)
        w = jax.random.uniform(kw, (fan_out, fan_in), dtype, -bound, bound)
        b = jax.random.uniform(kb, (fan_out,), dtype, -bound, bound)
        params.append((w, b))
    return params


def pack_params(params):
    """Pack the 5 (W, b) pairs into one (5,32,32) and one (5,32,1) f32 slab."""
    w_slab = jnp.zeros((N_LAYERS, HID, HID), jnp.float32)
    b_slab = jnp.zeros((N_LAYERS, HID, 1), jnp.float32)
    for k, (w, b) in enumerate(params):
        o, i = w.shape
        w_slab = w_slab.at[k, :o, :i].set(w.astype(jnp.float32))
        b_slab = b_slab.at[k, :o, 0].set(b.astype(jnp.float32))
    return w_slab, b_slab


@jax.jit
def net_sir_forward(x, w_slab, b_slab):
    """x: (B, 1) float32.  Returns (S, I, R, Ic, Inew) exactly like Net_SIR.forward."""
    B = x.shape[0]
    Bp = pl.cdiv(B, LANE_CHUNK) * LANE_CHUNK              # pad batch to lane multiple
    xt = jnp.zeros((1, Bp), jnp.float32).at[0, :B].set(x[:, 0].astype(jnp.float32))

    vmem = pl.BlockSpec(memory_space=pltpu.MemorySpace.VMEM)
    cost = pl.CostEstimate(
        flops=6720 * Bp,                                  # 1 bcast + 3x(32,32) + (8,32) GEMMs
        transcendentals=136 * Bp,                         # 4*32 tanh + 8 sigmoid per lane
        bytes_accessed=4 * (Bp + N_LAYERS * HID * HID + N_LAYERS * HID + 8 * Bp),
    )
    out = pl.pallas_call(
        _net_sir_kernel,
        out_shape=jax.ShapeDtypeStruct((8, Bp), jnp.float32),
        in_specs=[vmem, vmem, vmem],
        out_specs=vmem,
        cost_estimate=cost,
    )(xt, w_slab, b_slab)

    I, R, Ic, S = out[0, :B], out[1, :B], out[2, :B], out[3, :B]
    Inew = out[4, :B - 1]
    return S, I, R, Ic, Inew


if __name__ == "__main__":
    key = jax.random.PRNGKey(0)
    kx, kp = jax.random.split(key)

    params = init_params(kp)
    w_slab, b_slab = pack_params(params)

    def reference(x):
        h = x
        acts = [jnp.tanh] * 4 + [jax.nn.sigmoid]
        for (w, b), act in zip(params, acts):
            h = act(h @ w.T + b)
        I, R, Ic = h[:, 0], h[:, 1], h[:, 2]
        return (N_POP - I - R, I, R, Ic, Ic[1:] - Ic[:-1])

    # tiny PINN-style batch (seq=8) plus a lane-dense batch exercising 2 chunks
    for B in (8, 256):
        x = jax.random.uniform(jax.random.fold_in(kx, B), (B, 1), jnp.float32)
        outs = net_sir_forward(x, w_slab, b_slab)
        jax.block_until_ready(outs)
        refs = reference(x)
        for got, want in zip(outs, refs):
            assert got.shape == want.shape, (got.shape, want.shape)
            assert jnp.allclose(got, want, atol=1e-5), (got, want)

    S, I, R, Ic, Inew = outs
    assert S.shape == (256,) and Inew.shape == (255,)
    print("KERNEL_OK")
</pallas_src>

<mosaic_0001>
module attributes {stable_mosaic.version = 11 : i64} {
  func.func @_net_sir_kernel(%arg0: memref<1x128xf32, #tpu.memory_space<vmem>>, %arg1: memref<5x32x32xf32, #tpu.memory_space<vmem>>, %arg2: memref<5x32x1xf32, #tpu.memory_space<vmem>>, %arg3: memref<8x128xf32, #tpu.memory_space<vmem>>) attributes {dimension_semantics = [], scalar_prefetch = 0 : i64, scratch_operands = 0 : i64, tpu.core_type = #tpu.core_type<tc>} {
    %c0 = arith.constant 0 : index
    %c0_0 = arith.constant 0 : index
    %c0_1 = arith.constant 0 : index
    %0 = vector.load %arg1[%c0, %c0_0, %c0_1] : memref<5x32x32xf32, #tpu.memory_space<vmem>>, vector<1x32x32xf32>
    %1 = vector.shape_cast %0 : vector<1x32x32xf32> to vector<32x32xf32>
    %2 = vector.extract_strided_slice %1 {offsets = [0, 0], sizes = [32, 1], strides = [1, 1]} : vector<32x32xf32> to vector<32x1xf32>
    %c0_2 = arith.constant 0 : index
    %c0_3 = arith.constant 0 : index
    %c0_4 = arith.constant 0 : index
    %3 = vector.load %arg2[%c0_2, %c0_3, %c0_4] : memref<5x32x1xf32, #tpu.memory_space<vmem>>, vector<1x32x1xf32>
    %4 = vector.shape_cast %3 : vector<1x32x1xf32> to vector<32x1xf32>
    %c1 = arith.constant 1 : index
    %c0_5 = arith.constant 0 : index
    %c0_6 = arith.constant 0 : index
    %5 = vector.load %arg1[%c1, %c0_5, %c0_6] : memref<5x32x32xf32, #tpu.memory_space<vmem>>, vector<1x32x32xf32>
    %6 = vector.shape_cast %5 : vector<1x32x32xf32> to vector<32x32xf32>
    %c1_7 = arith.constant 1 : index
    %c0_8 = arith.constant 0 : index
    %c0_9 = arith.constant 0 : index
    %7 = vector.load %arg2[%c1_7, %c0_8, %c0_9] : memref<5x32x1xf32, #tpu.memory_space<vmem>>, vector<1x32x1xf32>
    %8 = vector.shape_cast %7 : vector<1x32x1xf32> to vector<32x1xf32>
    %c2 = arith.constant 2 : index
    %c0_10 = arith.constant 0 : index
    %c0_11 = arith.constant 0 : index
    %9 = vector.load %arg1[%c2, %c0_10, %c0_11] : memref<5x32x32xf32, #tpu.memory_space<vmem>>, vector<1x32x32xf32>
    %10 = vector.shape_cast %9 : vector<1x32x32xf32> to vector<32x32xf32>
    %c2_12 = arith.constant 2 : index
    %c0_13 = arith.constant 0 : index
    %c0_14 = arith.constant 0 : index
    %11 = vector.load %arg2[%c2_12, %c0_13, %c0_14] : memref<5x32x1xf32, #tpu.memory_space<vmem>>, vector<1x32x1xf32>
    %12 = vector.shape_cast %11 : vector<1x32x1xf32> to vector<32x1xf32>
    %c3 = arith.constant 3 : index
    %c0_15 = arith.constant 0 : index
    %c0_16 = arith.constant 0 : index
    %13 = vector.load %arg1[%c3, %c0_15, %c0_16] : memref<5x32x32xf32, #tpu.memory_space<vmem>>, vector<1x32x32xf32>
    %14 = vector.shape_cast %13 : vector<1x32x32xf32> to vector<32x32xf32>
    %c3_17 = arith.constant 3 : index
    %c0_18 = arith.constant 0 : index
    %c0_19 = arith.constant 0 : index
    %15 = vector.load %arg2[%c3_17, %c0_18, %c0_19] : memref<5x32x1xf32, #tpu.memory_space<vmem>>, vector<1x32x1xf32>
    %16 = vector.shape_cast %15 : vector<1x32x1xf32> to vector<32x1xf32>
    %c4 = arith.constant 4 : index
    %c0_20 = arith.constant 0 : index
    %c0_21 = arith.constant 0 : index
    %17 = vector.load %arg1[%c4, %c0_20, %c0_21] : memref<5x32x32xf32, #tpu.memory_space<vmem>>, vector<1x32x32xf32>
    %18 = vector.shape_cast %17 : vector<1x32x32xf32> to vector<32x32xf32>
    %19 = vector.extract_strided_slice %18 {offsets = [0, 0], sizes = [8, 32], strides = [1, 1]} : vector<32x32xf32> to vector<8x32xf32>
    %c4_22 = arith.constant 4 : index
    %c0_23 = arith.constant 0 : index
    %c0_24 = arith.constant 0 : index
    %20 = vector.load %arg2[%c4_22, %c0_23, %c0_24] : memref<5x32x1xf32, #tpu.memory_space<vmem>>, vector<1x32x1xf32>
    %21 = vector.shape_cast %20 : vector<1x32x1xf32> to vector<32x1xf32>
    %22 = vector.extract_strided_slice %21 {offsets = [0, 0], sizes = [8, 1], strides = [1, 1]} : vector<32x1xf32> to vector<8x1xf32>
    %c0_25 = arith.constant 0 : index
    %c0_26 = arith.constant 0 : index
    %23 = vector.load %arg0[%c0_25, %c0_26] : memref<1x128xf32, #tpu.memory_space<vmem>>, vector<1x128xf32>
    %24 = vector.broadcast %2 : vector<32x1xf32> to vector<32x128xf32>
    %25 = vector.broadcast %23 : vector<1x128xf32> to vector<32x128xf32>
    %26 = arith.mulf %24, %25 : vector<32x128xf32>
    %27 = vector.broadcast %4 : vector<32x1xf32> to vector<32x128xf32>
    %28 = arith.addf %26, %27 : vector<32x128xf32>
    %29 = math.tanh %28 : vector<32x128xf32>
    %cst = arith.constant dense<0.000000e+00> : vector<32x128xf32>
    %30 = tpu.matmul %6, %29, %cst {dimension_numbers = #tpu.dot_dimension_numbers<[1], [0], [0], [1], [0, 0, 1, 1], [], []>} : vector<32x32xf32>, vector<32x128xf32>, vector<32x128xf32> -> vector<32x128xf32>
    %31 = vector.broadcast %8 : vector<32x1xf32> to vector<32x128xf32>
    %32 = arith.addf %30, %31 : vector<32x128xf32>
    %33 = math.tanh %32 : vector<32x128xf32>
    %cst_27 = arith.constant dense<0.000000e+00> : vector<32x128xf32>
    %34 = tpu.matmul %10, %33, %cst_27 {dimension_numbers = #tpu.dot_dimension_numbers<[1], [0], [0], [1], [0, 0, 1, 1], [], []>} : vector<32x32xf32>, vector<32x128xf32>, vector<32x128xf32> -> vector<32x128xf32>
    %35 = vector.broadcast %12 : vector<32x1xf32> to vector<32x128xf32>
    %36 = arith.addf %34, %35 : vector<32x128xf32>
    %37 = math.tanh %36 : vector<32x128xf32>
    %cst_28 = arith.constant dense<0.000000e+00> : vector<32x128xf32>
    %38 = tpu.matmul %14, %37, %cst_28 {dimension_numbers = #tpu.dot_dimension_numbers<[1], [0], [0], [1], [0, 0, 1, 1], [], []>} : vector<32x32xf32>, vector<32x128xf32>, vector<32x128xf32> -> vector<32x128xf32>
    %39 = vector.broadcast %16 : vector<32x1xf32> to vector<32x128xf32>
    %40 = arith.addf %38, %39 : vector<32x128xf32>
    %41 = math.tanh %40 : vector<32x128xf32>
    %cst_29 = arith.constant dense<0.000000e+00> : vector<8x128xf32>
    %42 = tpu.matmul %19, %41, %cst_29 {dimension_numbers = #tpu.dot_dimension_numbers<[1], [0], [0], [1], [0, 0, 1, 1], [], []>} : vector<8x32xf32>, vector<32x128xf32>, vector<8x128xf32> -> vector<8x128xf32>
    %43 = vector.broadcast %22 : vector<8x1xf32> to vector<8x128xf32>
    %44 = arith.addf %42, %43 : vector<8x128xf32>
    %45 = arith.negf %44 : vector<8x128xf32>
    %46 = math.exp %45 : vector<8x128xf32>
    %cst_30 = arith.constant 1.000000e+00 : f32
    %47 = vector.broadcast %cst_30 : f32 to vector<8x128xf32>
    %48 = arith.addf %47, %46 : vector<8x128xf32>
    %49 = arith.divf %47, %48 : vector<8x128xf32>
    %50 = vector.extract_strided_slice %49 {offsets = [0, 0], sizes = [3, 128], strides = [1, 1]} : vector<8x128xf32> to vector<3x128xf32>
    %c0_31 = arith.constant 0 : index
    %c0_32 = arith.constant 0 : index
    %51 = vector.load %arg3[%c0_31, %c0_32] : memref<8x128xf32, #tpu.memory_space<vmem>>, vector<3x128xf32>
    tpu.vector_store %arg3[%c0_31, %c0_32], %50 {strides = array<i32>} : memref<8x128xf32, #tpu.memory_space<vmem>>, vector<3x128xf32>,
    %52 = vector.extract_strided_slice %49 {offsets = [0, 0], sizes = [1, 128], strides = [1, 1]} : vector<8x128xf32> to vector<1x128xf32>
    %cst_33 = arith.constant 1.000000e+00 : f32
    %53 = vector.broadcast %cst_33 : f32 to vector<1x128xf32>
    %54 = arith.subf %53, %52 : vector<1x128xf32>
    %55 = vector.extract_strided_slice %49 {offsets = [1, 0], sizes = [1, 128], strides = [1, 1]} : vector<8x128xf32> to vector<1x128xf32>
    %56 = arith.subf %54, %55 : vector<1x128xf32>
    %c3_34 = arith.constant 3 : index
    %c0_35 = arith.constant 0 : index
    %57 = vector.load %arg3[%c3_34, %c0_35] : memref<8x128xf32, #tpu.memory_space<vmem>>, vector<1x128xf32>
    tpu.vector_store %arg3[%c3_34, %c0_35], %56 {strides = array<i32>} : memref<8x128xf32, #tpu.memory_space<vmem>>, vector<1x128xf32>,
    %c2_36 = arith.constant 2 : index
    %c0_37 = arith.constant 0 : index
    %58 = vector.load %arg3[%c2_36, %c0_37] : memref<8x128xf32, #tpu.memory_space<vmem>>, vector<1x128xf32>
    %c127_i32 = arith.constant 127 : i32
    %59 = tpu.dynamic_rotate %58 by %c127_i32 dim 1 : vector<1x128xf32>, i32 -> vector<1x128xf32>
    %60 = arith.subf %59, %58 : vector<1x128xf32>
    %c4_38 = arith.constant 4 : index
    %c0_39 = arith.constant 0 : index
    %61 = vector.load %arg3[%c4_38, %c0_39] : memref<8x128xf32, #tpu.memory_space<vmem>>, vector<1x128xf32>
    tpu.vector_store %arg3[%c4_38, %c0_39], %60 {strides = array<i32>} : memref<8x128xf32, #tpu.memory_space<vmem>>, vector<1x128xf32>,
    return
  }
}

</mosaic_0001>

<bundles_post_ra>
// kernel: net_sir_forward.1
= control target key start
LH: loop header
LB: loop body
LE: loop exit
PB: predicated region body
PF: predicated region fallthrough
CT: control target
= control target key end

     0   :  { %v453_v0 = vmov 0   ;;  %vm132_vm0 = vcmask 261120   ;;  %s454_s29 = smov 127   ;;  %s605_s2 = inlined_call_operand.vmem [shape: f32[5,32,1], index: 2, kind: input, shape index: {}]   ;;  %s606_s1 = inlined_call_operand.vmem [shape: f32[5,32,32], index: 1, kind: input, shape index: {}]   ;;  %s607_s0 = inlined_call_operand.vmem [shape: f32[1,128], index: 0, kind: input, shape index: {}]   ;;  %s608_s3 = inlined_call_operand.vmem [shape: f32[8,128], index: 3, kind: output, shape index: {}]  }
   0x1   :  { %415 = vset.pattern.permute.xlu2 %v453_v0  ;;  %414 = vset.pattern.permute.xlu1 %v453_v0  ;;  %v21_v1 = vld [vmem:[%s605_s2 + $0x18] sm:$0xff]  ;;  %v20_v2 = vld [vmem:[%s605_s2 + $0x10] sm:$0xff]  ;;  %v15_v4 = vld [vmem:[%s606_s1 + $0x8] sm:$0xff] }
   0x2   :  { %v17_v3 = vld [vmem:[%s606_s1 + $0x18] sm:$0xff]  ;;  %413 = vset.pattern.permute.xlu0 %v453_v0  ;;  %101 = vperm.xlu1 %414, %v21_v1   ;;  %v16_v5 = vld [vmem:[%s606_s1 + $0x10] sm:$0xff]  ;;  %v14_v6 = vld [vmem:[%s606_s1] sm:$0xff] }
   0x3   :  { %96 = vperm.xlu2 %415, %v20_v2   ;;  %74 = vperm.xlu0 %413, %v17_v3   ;;  %v18_v7 = vld [vmem:[%s605_s2] sm:$0xff]  ;;  %v19_v8 = vld [vmem:[%s605_s2 + $0x8] sm:$0xff]  ;;  %v378_v9 = vld [vmem:[%s605_s2 + $0x38] sm:$0xff] }
   0x4   :  { %v376_v10 = vld [vmem:[%s605_s2 + $0x28] sm:$0xff]  ;;  %v377_v11 = vld [vmem:[%s605_s2 + $0x30] sm:$0xff]  ;;  %v375_v12 = vld [vmem:[%s605_s2 + $0x20] sm:$0xff] }
   0x5   :  { %v385_v13 = vld [vmem:[%s605_s2 + $0x50] sm:$0xff]  ;;  %v386_v14 = vld [vmem:[%s605_s2 + $0x58] sm:$0xff]  ;;  %v384_v15 = vld [vmem:[%s605_s2 + $0x48] sm:$0xff] }
   0x6   :  { %v394_v16 = vld [vmem:[%s605_s2 + $0x78] sm:$0xff]  ;;  %v383_v17 = vld [vmem:[%s605_s2 + $0x40] sm:$0xff]  ;;  %v393_v18 = vld [vmem:[%s605_s2 + $0x70] sm:$0xff] }
   0x7   :  { %v391_v19 = vld [vmem:[%s605_s2 + $0x60] sm:$0xff]  ;;  %v392_v20 = vld [vmem:[%s605_s2 + $0x68] sm:$0xff]  ;;  %v373_v45 = vld [vmem:[%s606_s1 + $0x30] sm:$0xff] }
   0x8   :  { %v396_v21 = vld [vmem:[%s605_s2 + $0x80] sm:$0xff]  ;;  %v372_v44 = vld [vmem:[%s606_s1 + $0x28] sm:$0xff]  ;;  %v374_v46 = vld [vmem:[%s606_s1 + $0x38] sm:$0xff] }
   0x9   :  { %v416_v22 = vld [vmem:[%s607_s0] ss:$0 sm:$0xff]  ;;  %v380_v0 = vld [vmem:[%s606_s1 + $0x48] sm:$0xff]  ;;  %v381_v1 = vld [vmem:[%s606_s1 + $0x50] sm:$0xff] }
   0xa   :  { %64 = vperm.xlu1 %414, %v15_v4   ;;  %v371_v42 = vld [vmem:[%s606_s1 + $0x20] sm:$0xff]  ;;  %v382_v2 = vld [vmem:[%s606_s1 + $0x58] sm:$0xff] }
   0xb   :  { %69 = vperm.xlu0 %413, %v16_v5   ;;  %59 = vperm.xlu2 %415, %v14_v6   ;;  %v379_v62 = vld [vmem:[%s606_s1 + $0x40] sm:$0xff] }
  0x12   :  { %86 = vperm.xlu1 %414, %v18_v7  }
  0x13   :  { %91 = vperm.xlu0 %413, %v19_v8   ;;  %129 = vperm.xlu2 %415, %v378_v9  }
  0x1a   :  { %119 = vperm.xlu1 %414, %v376_v10  }
  0x1b   :  { %124 = vperm.xlu0 %413, %v377_v11   ;;  %114 = vperm.xlu2 %415, %v375_v12  }
  0x22   :  { %190 = vperm.xlu1 %414, %v385_v13  }
  0x23   :  { %195 = vperm.xlu0 %413, %v386_v14   ;;  %185 = vperm.xlu2 %415, %v384_v15  }
  0x2a   :  { %260 = vperm.xlu1 %414, %v394_v16  }
  0x2b   :  { %180 = vperm.xlu0 %413, %v383_v17   ;;  %255 = vperm.xlu2 %415, %v393_v18   ;;  %v387_v18 = vld [vmem:[%s606_s1 + $0x60] sm:$0xff] }
  0x32   :  { %245 = vperm.xlu1 %414, %v391_v19  }
  0x33   :  { %250 = vperm.xlu0 %413, %v392_v20   ;;  %310 = vperm.xlu2 %415, %v396_v21   ;;  %v388_v20 = vld [vmem:[%s606_s1 + $0x68] sm:$0xff]  ;;  %v389_v21 = vld [vmem:[%s606_s1 + $0x70] sm:$0xff] }
  0x5d   :  { %v97_v27 = vpop.permute.xlu2 %96 }
  0x65   :  { %v60_v33 = vpop.permute.xlu2 %59 }
  0x66   :  { %v80_v34 = vmul.f32 %v416_v22, %v60_v33 }
  0x6d   :  { %v130_v50 = vpop.permute.xlu2 %129 }
  0x74   :  { %v102_v23 = vpop.permute.xlu1 %101 }
  0x75   :  { %v75_v24 = vpop.permute.xlu0 %74  ;;  %v115_v57 = vpop.permute.xlu2 %114 }
  0x76   :  { %v83_v25 = vmul.f32 %v416_v22, %v75_v24 }
  0x78   :  { %v107_v26 = vadd.f32 %v102_v23, %v83_v25 }
  0x7a   :  { %417 = vtanh.f32 %v107_v26 }
  0x7c   :  { %v65_v28 = vpop.permute.xlu1 %64 }
  0x7d   :  { %v70_v29 = vpop.permute.xlu0 %69  ;;  %v81_v35 = vmul.f32 %v416_v22, %v65_v28  ;;  %v186_v11 = vpop.permute.xlu2 %185 }
  0x7e   :  { %v82_v30 = vmul.f32 %v416_v22, %v70_v29  ;;  %v390_v22 = vld [vmem:[%s606_s1 + $0x78] sm:$0xff] }
  0x80   :  { %v418_v31 = vpop.eup %417  ;;  %v106_v32 = vadd.f32 %v97_v27, %v82_v30 }
  0x81   :  { %157 = vmatpush.msra.mxu0 %v418_v31 }
  0x82   :  { %419 = vtanh.f32 %v106_v32 }
  0x84   :  { %v87_v36 = vpop.permute.xlu1 %86 }
  0x85   :  { %v92_v37 = vpop.permute.xlu0 %91  ;;  %v104_v39 = vadd.f32 %v87_v36, %v80_v34  ;;  %v256_v27 = vpop.permute.xlu2 %255 }
  0x86   :  { %v105_v38 = vadd.f32 %v92_v37, %v81_v35 }
  0x88   :  { %v420_v40 = vpop.eup %419  ;;  %421 = vtanh.f32 %v105_v38  ;;  %v395_v38 = vld [vmem:[%s606_s1 + $0x80] sm:$0xff] }
  0x89   :  { %158 = vmatpush.msra.mxu0 %v420_v40  ;;  %423 = vtanh.f32 %v104_v39 }
  0x8c   :  { %v120_v55 = vpop.permute.xlu1 %119 }
  0x8d   :  { %v125_v51 = vpop.permute.xlu0 %124  ;;  %v311_v40 = vpop.permute.xlu2 %310 }
  0x8e   :  { %v422_v41 = vpop.eup %421 }
  0x8f   :  { %159 = vmatpush.msra.mxu0 %v422_v41  ;;  %v424_v43 = vpop.eup %423 }
  0x91   :  { %160 = vmatpush.msra.mxu0 %v424_v43 }
  0x92   :  { %397 = vmatmul.msk.f32.vlgmr.msra.gmra.mxu0 %vm132_vm0, %v371_v42 }
  0x94   :  { %v191_v7 = vpop.permute.xlu1 %190 }
  0x95   :  { %v196_v6 = vpop.permute.xlu0 %195 }
  0x9a   :  { %398 = vmatmul.msk.f32.gmra.mxu0 %vm132_vm0, %v372_v44 }
  0x9c   :  { %v261_v26 = vpop.permute.xlu1 %260 }
  0x9d   :  { %v181_v13 = vpop.permute.xlu0 %180 }
  0xa2   :  { %399 = vmatmul.msk.f32.gmra.mxu0 %vm132_vm0, %v373_v45 }
  0xa4   :  { %v246_v33 = vpop.permute.xlu1 %245 }
  0xa5   :  { %v251_v31 = vpop.permute.xlu0 %250 }
  0xaa   :  { %400 = vmatmul.msk.f32.gmra.mxu0 %vm132_vm0, %v374_v46 }
 0x10f   :  { %v162_v47 = vpop.f32.mrf.mxu0 }
 0x110   :  { %v163_v58 = vadd.f32 %v162_v47, %v115_v57 }
 0x117   :  { %v165_v48 = vpop.f32.mrf.mxu0 }
 0x118   :  { %v166_v56 = vadd.f32 %v165_v48, %v120_v55 }
 0x11f   :  { %v168_v49 = vpop.f32.mrf.mxu0 }
 0x120   :  { %v169_v53 = vadd.f32 %v168_v49, %v125_v51 }
 0x127   :  { %v171_v52 = vpop.f32.mrf.mxu0 }
 0x128   :  { %v172_v54 = vadd.f32 %v171_v52, %v130_v50 }
 0x12a   :  { %425 = vtanh.f32 %v172_v54 }
 0x12b   :  { %427 = vtanh.f32 %v169_v53 }
 0x12c   :  { %429 = vtanh.f32 %v166_v56 }
 0x12d   :  { %431 = vtanh.f32 %v163_v58 }
 0x130   :  { %v426_v59 = vpop.eup %425 }
 0x131   :  { %222 = vmatpush.msra.mxu1 %v426_v59  ;;  %v428_v60 = vpop.eup %427 }
 0x132   :  { %v430_v61 = vpop.eup %429 }
 0x133   :  { %223 = vmatpush.msra.mxu1 %v428_v60  ;;  %v432_v63 = vpop.eup %431 }
 0x135   :  { %224 = vmatpush.msra.mxu1 %v430_v61 }
 0x137   :  { %225 = vmatpush.msra.mxu1 %v432_v63 }
 0x138   :  { %401 = vmatmul.msk.f32.vlgmr.msra.gmra.mxu1 %vm132_vm0, %v379_v62 }
 0x140   :  { %402 = vmatmul.msk.f32.gmra.mxu1 %vm132_vm0, %v380_v0 }
 0x148   :  { %403 = vmatmul.msk.f32.gmra.mxu1 %vm132_vm0, %v381_v1 }
 0x150   :  { %404 = vmatmul.msk.f32.gmra.mxu1 %vm132_vm0, %v382_v2 }
 0x1b5   :  { %v227_v3 = vpop.f32.mrf.mxu1 }
 0x1b6   :  { %v228_v14 = vadd.f32 %v227_v3, %v181_v13 }
 0x1bd   :  { %v230_v4 = vpop.f32.mrf.mxu1 }
 0x1be   :  { %v231_v12 = vadd.f32 %v230_v4, %v186_v11 }
 0x1c5   :  { %v233_v5 = vpop.f32.mrf.mxu1 }
 0x1c6   :  { %v234_v9 = vadd.f32 %v233_v5, %v191_v7 }
 0x1cd   :  { %v236_v8 = vpop.f32.mrf.mxu1 }
 0x1ce   :  { %v237_v10 = vadd.f32 %v236_v8, %v196_v6 }
 0x1d0   :  { %433 = vtanh.f32 %v237_v10 }
 0x1d1   :  { %435 = vtanh.f32 %v234_v9 }
 0x1d2   :  { %437 = vtanh.f32 %v231_v12 }
 0x1d3   :  { %439 = vtanh.f32 %v228_v14 }
 0x1d6   :  { %v434_v15 = vpop.eup %433 }
 0x1d7   :  { %287 = vmatpush.msra.mxu2 %v434_v15  ;;  %v436_v16 = vpop.eup %435 }
 0x1d8   :  { %v438_v17 = vpop.eup %437 }
 0x1d9   :  { %288 = vmatpush.msra.mxu2 %v436_v16  ;;  %v440_v19 = vpop.eup %439 }
 0x1db   :  { %289 = vmatpush.msra.mxu2 %v438_v17 }
 0x1dd   :  { %290 = vmatpush.msra.mxu2 %v440_v19 }
 0x1de   :  { %405 = vmatmul.msk.f32.vlgmr.msra.gmra.mxu2 %vm132_vm0, %v387_v18 }
 0x1e6   :  { %406 = vmatmul.msk.f32.gmra.mxu2 %vm132_vm0, %v388_v20 }
 0x1ee   :  { %407 = vmatmul.msk.f32.gmra.mxu2 %vm132_vm0, %v389_v21 }
 0x1f6   :  { %408 = vmatmul.msk.f32.gmra.mxu2 %vm132_vm0, %v390_v22 }
 0x261   :  { %v292_v23 = vpop.f32.mrf.mxu2 }
 0x262   :  { %v293_v34 = vadd.f32 %v292_v23, %v246_v33 }
 0x269   :  { %v295_v24 = vpop.f32.mrf.mxu2 }
 0x26a   :  { %v296_v32 = vadd.f32 %v295_v24, %v251_v31 }
 0x271   :  { %v298_v25 = vpop.f32.mrf.mxu2 }
 0x272   :  { %v299_v29 = vadd.f32 %v298_v25, %v256_v27 }
 0x279   :  { %v301_v28 = vpop.f32.mrf.mxu2 }
 0x27a   :  { %v302_v30 = vadd.f32 %v301_v28, %v261_v26 }
 0x27c   :  { %441 = vtanh.f32 %v302_v30 }
 0x27d   :  { %443 = vtanh.f32 %v299_v29 }
 0x27e   :  { %445 = vtanh.f32 %v296_v32 }
 0x27f   :  { %447 = vtanh.f32 %v293_v34 }
 0x282   :  { %v442_v35 = vpop.eup %441 }
 0x283   :  { %328 = vmatpush.msra.mxu3 %v442_v35  ;;  %v444_v36 = vpop.eup %443 }
 0x284   :  { %v446_v37 = vpop.eup %445 }
 0x285   :  { %329 = vmatpush.msra.mxu3 %v444_v36  ;;  %v448_v39 = vpop.eup %447 }
 0x287   :  { %330 = vmatpush.msra.mxu3 %v446_v37 }
 0x289   :  { %331 = vmatpush.msra.mxu3 %v448_v39 }
 0x28a   :  { %409 = vmatmul.msk.f32.vlgmr.msra.gmra.mxu3 %vm132_vm0, %v395_v38 }
 0x30d   :  { %v333_v41 = vpop.f32.mrf.mxu3 }
 0x30e   :  { %v334_v42 = vadd.f32 %v333_v41, %v311_v40 }
 0x310   :  { %v410_v43 = vmul.f32 -1.442695, %v334_v42 }
 0x312   :  { %449 = vpow2.f32 %v410_v43 }
 0x318   :  { %v450_v44 = vpop.eup %449 }
 0x319   :  { %v339_v45 = vadd.f32 1.0, %v450_v44 }
 0x31b   :  { %451 = vrcp.f32 %v339_v45  ;;  %v351_v49 = vand.u32 2147483648, %v339_v45  ;;  %v349_v51 = vand.u32 2147483647, %v339_v45  ;;  %vm345_vm2 = vweird.f32 %v339_v45 }
 0x31d   :  { %v352_v53 = vor.u32 1.1754944e-38, %v351_v49  ;;  %vm350_vm4 = vcmp.eq.f32.partialorder %v349_v51, 8.507059e+37 }
 0x321   :  { %v452_v46 = vpop.eup %451 }
 0x322   :  { %v341_v47 = vmul.f32 %v452_v46, %v339_v45  ;;  %vm346_vm1 = vweird.f32 %v452_v46 }
 0x323   :  { %vm347_vm3 = vmor %vm345_vm2, %vm346_vm1 }
 0x324   :  { %v342_v48 = vsub.f32 1.0, %v341_v47 }
 0x326   :  { %v343_v50 = vmul.f32 %v452_v46, %v342_v48 }
 0x328   :  { %v344_v52 = vadd.f32 %v452_v46, %v343_v50 }
 0x32a   :  { %v348_v54 = vsel %vm347_vm3, %v452_v46, %v344_v52 }
 0x32b   :  { %v353_v55 = vsel %vm350_vm4, %v352_v53, %v348_v54 }
 0x32c   :  { %355 = vst [vmem:[%s608_s3] sm:$0x7] %v353_v55  ;;  %v356_v56 = vsub.f32 1.0, %v353_v55  ;;  %v358_v57 = vrot.slane %v353_v55, 1 }
 0x32e   :  { %v360_v58 = vsub.f32 %v356_v56, %v358_v57 }
 0x330   :  { %361 = vst [vmem:[%s608_s3 + $0x3] sm:$0x1] %v360_v58 }
 0x333   :  { %v362_v59 = vld [vmem:[%s608_s3 + $0x2] sm:$0x1] }
 0x334   :  { %363 = vrot.lane.b32.xlu0 %v362_v59, %s454_s29 }
 0x3a6   :  { %v364_v60 = vpop.permute.xlu0 %363 }
 0x3a7   :  { %v365_v61 = vsub.f32 %v364_v60, %v362_v59 }
 0x3a9   :  { %366 = vst [vmem:[%s608_s3 + $0x4] sm:$0x1] %v365_v61 }

</bundles_post_ra>
